<compile_context>
chip_gen: v5e
topology: v5e:2x2
jax: 0.10.0
libtpu: 0.0.40
codegen_flags: <defaults>
</compile_context>

<pallas_src>
import functools
import math

import jax
import jax.numpy as jnp
from jax.experimental import pallas as pl
from jax.experimental.pallas import tpu as pltpu


def _round_up(v, m):
    return ((v + m - 1) // m) * m


def _pick_tile(padded_dim, align, cap):
    """Largest multiple of `align` that divides `padded_dim` and is <= cap."""
    best = align
    t = align
    limit = min(cap, padded_dim)
    while t <= limit:
        if padded_dim % t == 0:
            best = t
        t += align
    return best


def _vmem_capacity_bytes():
    try:
        return int(pltpu.get_tpu_info().vmem_capacity_bytes)
    except Exception:
        return 64 << 20  # conservative fallback (v7x per-TC capacity)


# ----------------------------------------------------------------------------
# Kernel
# ----------------------------------------------------------------------------
def _linear_wn_kernel(x_ref, w_ref, s_ref, b_ref, o_ref, acc_ref, *, use_gelu):
    """One (tm, tn) output tile.  Grid = (M/tm, N/tn, K/tk), K innermost."""
    k = pl.program_id(2)

    prod = jnp.dot(x_ref[...], w_ref[...], preferred_element_type=jnp.float32)

    @pl.when(k == 0)
    def _():
        acc_ref[...] = prod          # direct assign: no zero-init store + reload

    @pl.when(k > 0)
    def _():
        acc_ref[...] += prod

    @pl.when(k == pl.num_programs(2) - 1)
    def _():
        # weight_norm folded into a per-output-column scale, applied once:
        #   y = (x @ V^T) * (g / ||V||_row) + b
        y = acc_ref[...] * s_ref[...] + b_ref[...]          # (tm,tn)*(1,tn)+(1,tn)
        if use_gelu:
            y = 0.5 * y * (1.0 + jnp.tanh(y * 0.7978845608 * (1.0 + 0.044715 * y * y)))
        o_ref[...] = y.astype(o_ref.dtype)


# ----------------------------------------------------------------------------
# One-time parameter preparation (hoisted out of the hot path)
# ----------------------------------------------------------------------------
def prepare_linear_params(weight_v, weight_g, bias, *, compute_dtype=None):
    """Fold weight_norm and relayout the weight once, at parameter-prep time.

    Returns:
      w_kn   : (K, N) = V^T in `compute_dtype` (or native dtype) — matmul operand
      scale  : (1, N) f32,  g / ||V||_row       — epilogue per-column scale
      bias2d : (1, N) f32
    """
    N, K = weight_v.shape
    v32 = weight_v.astype(jnp.float32)
    norm = jnp.sqrt(jnp.sum(v32 * v32, axis=1, keepdims=True))          # (N, 1)
    scale = (weight_g.reshape(N, 1).astype(jnp.float32) / norm).reshape(1, N)
    bias2d = bias.astype(jnp.float32).reshape(1, N)
    w_kn = weight_v.T
    if compute_dtype is not None:
        w_kn = w_kn.astype(compute_dtype)
    return w_kn, scale, bias2d


# ----------------------------------------------------------------------------
# Forward pass (hot path)
# ----------------------------------------------------------------------------
def linear_weightnorm_apply(x, w_kn, scale, bias2d, *, activations=False,
                            tm=None, tn=None, tk=None, weight_buffers=None,
                            out_dtype=None):
    """y = gelu?( (x @ w_kn) * scale + bias )   with pre-prepared parameters."""
    assert x.ndim == 2 and w_kn.ndim == 2
    B = x.shape[0]
    K, N = w_kn.shape
    if x.dtype != w_kn.dtype:
        x = x.astype(w_kn.dtype)                      # feed the MXU in compute dtype
    out_dtype = x.dtype if out_dtype is None else out_dtype

    in_item = jnp.dtype(x.dtype).itemsize
    out_item = jnp.dtype(out_dtype).itemsize
    m_align = {4: 8, 2: 16, 1: 32}.get(in_item, 8)    # sublane packing per dtype

    # ---- tile selection: divisors of minimally padded dims, VMEM-filling caps ----
    if tm is None:
        Mp = _round_up(B, m_align)
        tm = _pick_tile(Mp, m_align, 256)
    else:
        Mp = _round_up(B, tm)
    if tk is None:
        Kp = _round_up(K, 128)
        tk = _pick_tile(Kp, 128, 512)
    else:
        Kp = _round_up(K, tk)
    if tn is None:
        Np = _round_up(N, 128)
        tn = _pick_tile(Np, 128, 1024)
        # Guarantee >= 2 parallel grid blocks so both v7x TensorCores get work.
        if (Mp // tm) * (Np // tn) == 1 and Np >= 256:
            tn = _pick_tile(Np, 128, Np // 2)
    else:
        Np = _round_up(N, tn)

    m_blocks, n_blocks, k_blocks = Mp // tm, Np // tn, Kp // tk

    if weight_buffers is None:
        # Small-batch weight-streaming regime: deepen the weight pipeline.
        weight_buffers = 3 if (m_blocks == 1 and k_blocks >= 2) else 2

    # ---- zero-pad (padded K contributes exact zeros; padded M/N sliced off) ----
    x_p = x if (Mp == B and Kp == K) else jnp.pad(x, ((0, Mp - B), (0, Kp - K)))
    w_p = w_kn if (Kp == K and Np == N) else jnp.pad(w_kn, ((0, Kp - K), (0, Np - N)))
    s_p = scale if Np == N else jnp.pad(scale, ((0, 0), (0, Np - N)))
    b_p = bias2d if Np == N else jnp.pad(bias2d, ((0, 0), (0, Np - N)))

    grid = (m_blocks, n_blocks, k_blocks)
    kernel = functools.partial(_linear_wn_kernel, use_gelu=activations)

    cost = pl.CostEstimate(
        flops=2 * B * K * N,
        transcendentals=(B * N) if activations else 0,
        bytes_accessed=(B * K + K * N) * in_item + 2 * N * 4 + B * N * out_item,
    )

    def _run(wbuf):
        if wbuf != 2:
            try:
                w_spec = pl.BlockSpec((tk, tn), lambda i, j, k: (k, j),
                                      pipeline_mode=pl.Buffered(wbuf))
            except TypeError:
                w_spec = pl.BlockSpec((tk, tn), lambda i, j, k: (k, j))
        else:
            w_spec = pl.BlockSpec((tk, tn), lambda i, j, k: (k, j))

        # Actual double/triple-buffered VMEM footprint -> request it with margin,
        # clamped to this chip's capacity (64 MiB/TC on v7x, 128 MiB on v5e/v6e).
        needed = (2 * tm * tk * in_item + wbuf * tk * tn * in_item
                  + 2 * tm * tn * out_item + tm * tn * 4 + 4 * 2 * tn * 4)
        vmem_limit = int(min(max(needed * 5 // 4 + (2 << 20), 32 << 20),
                             _vmem_capacity_bytes() * 3 // 4))

        return pl.pallas_call(
            kernel,
            out_shape=jax.ShapeDtypeStruct((Mp, Np), out_dtype),
            grid_spec=pltpu.PrefetchScalarGridSpec(
                num_scalar_prefetch=0,
                grid=grid,
                in_specs=[
                    pl.BlockSpec((tm, tk), lambda i, j, k: (i, k)),   # x tile
                    w_spec,                                           # weight (K,N) tile
                    pl.BlockSpec((1, tn), lambda i, j, k: (0, j)),    # scale (epilogue)
                    pl.BlockSpec((1, tn), lambda i, j, k: (0, j)),    # bias  (epilogue)
                ],
                out_specs=pl.BlockSpec((tm, tn), lambda i, j, k: (i, j)),
                scratch_shapes=[pltpu.VMEM((tm, tn), jnp.float32)],
            ),
            compiler_params=pltpu.CompilerParams(
                dimension_semantics=("parallel", "parallel", "arbitrary"),
                vmem_limit_bytes=vmem_limit,
            ),
            cost_estimate=cost,
        )(x_p, w_p, s_p, b_p)

    try:
        out_p = _run(weight_buffers)
    except Exception:
        if weight_buffers == 2:
            raise
        out_p = _run(2)     # fall back to default double-buffering

    return out_p[:B, :N]


def linear_weightnorm(x, weight_v, weight_g, bias, *, activations=False,
                      compute_dtype=None, **kwargs):
    """Convenience wrapper (prep + apply). For repeated calls, call
    `prepare_linear_params` once and reuse its outputs with
    `linear_weightnorm_apply` — the weight prep should NOT be in the hot path."""
    w_kn, scale, bias2d = prepare_linear_params(weight_v, weight_g, bias,
                                                compute_dtype=compute_dtype)
    return linear_weightnorm_apply(x, w_kn, scale, bias2d,
                                   activations=activations,
                                   out_dtype=x.dtype, **kwargs)


# ----------------------------------------------------------------------------
# Init (matches the PyTorch module's __init__) and pure-JAX reference
# ----------------------------------------------------------------------------
def make_params(key, in_features, out_features, activations=False, dtype=jnp.float32):
    std = math.sqrt((2.0 if activations else 1.0) / in_features)
    v = (std * jax.random.normal(key, (out_features, in_features),
                                 dtype=jnp.float32)).astype(dtype)
    # weight_norm init: g = ||v|| per output row (so W_eff == v at init)
    g = jnp.sqrt(jnp.sum(v.astype(jnp.float32) ** 2, axis=1, keepdims=True))
    b = jnp.zeros((out_features,), dtype=jnp.float32)
    return v, g, b


def _reference(x, weight_v, weight_g, bias, activations):
    v = weight_v.astype(jnp.float32)
    norm = jnp.sqrt(jnp.sum(v * v, axis=1, keepdims=True))
    w_eff = weight_g.reshape(-1, 1) * v / norm
    y = x.astype(jnp.float32) @ w_eff.T + bias[None, :]
    if activations:
        y = 0.5 * y * (1.0 + jnp.tanh(y * 0.7978845608 * (1.0 + 0.044715 * y * y)))
    return y


if __name__ == "__main__":
    key = jax.random.PRNGKey(0)
    k_x, k_w = jax.random.split(key)

    # 1) f32, forced small tiles: exercises the (2, 2, 3) grid and K accumulation.
    B, K, N = 16, 384, 256
    x = jax.random.normal(k_x, (B, K), dtype=jnp.float32)
    v, g, b = make_params(k_w, K, N, activations=True)
    out = linear_weightnorm(x, v, g, b, activations=True, tm=8, tn=128, tk=128)
    out = jax.block_until_ready(out)
    ref = _reference(x, v, g, b, True)
    assert out.shape == (B, N)
    assert jnp.allclose(out.astype(jnp.float32), ref, atol=1e-4, rtol=1e-4)

    # 2) f32, auto tiling, non-aligned shapes (padding + slice-back path).
    x2 = jax.random.normal(k_x, (6, 200), dtype=jnp.float32)
    v2, g2, b2 = make_params(k_w, 200, 96, activations=False)
    out2 = jax.block_until_ready(linear_weightnorm(x2, v2, g2, b2, activations=False))
    ref2 = _reference(x2, v2, g2, b2, False)
    assert out2.shape == (6, 96)
    assert jnp.allclose(out2.astype(jnp.float32), ref2, atol=1e-4, rtol=1e-4)

    # 3) bf16 operands with params prepared once (the recommended hot-path usage):
    #    exercises divisor tiling, the >=2-parallel-block split and the deeper
    #    weight pipeline used for small-batch weight-streaming configs.
    B3, K3, N3 = 4, 1024, 512
    x3 = jax.random.normal(k_x, (B3, K3), dtype=jnp.float32)
    v3, g3, b3 = make_params(k_w, K3, N3, activations=True)
    w_kn3, s3, bb3 = prepare_linear_params(v3, g3, b3, compute_dtype=jnp.bfloat16)
    out3 = jax.block_until_ready(
        linear_weightnorm_apply(x3, w_kn3, s3, bb3, activations=True,
                                out_dtype=jnp.float32))
    ref3 = _reference(x3, v3, g3, b3, True)
    assert out3.shape == (B3, N3)
    assert jnp.allclose(out3, ref3, atol=5e-2, rtol=5e-2)

    print("KERNEL_OK")
</pallas_src>

<mosaic_0001>
module attributes {stable_mosaic.version = 11 : i64} {
  func.func @_linear_wn_kernel(%arg0: i32, %arg1: i32, %arg2: i32, %arg3: memref<8x128xf32, #tpu.memory_space<vmem>>, %arg4: memref<128x128xf32, #tpu.memory_space<vmem>>, %arg5: memref<1x128xf32, #tpu.memory_space<vmem>>, %arg6: memref<1x128xf32, #tpu.memory_space<vmem>>, %arg7: memref<8x128xf32, #tpu.memory_space<vmem>>, %arg8: memref<8x128xf32, #tpu.memory_space<vmem>>) attributes {dimension_semantics = [#tpu.dimension_semantics<parallel>, #tpu.dimension_semantics<parallel>, #tpu.dimension_semantics<arbitrary>], iteration_bounds = array<i64: 2, 2, 3>, scalar_prefetch = 0 : i64, scratch_operands = 1 : i64, tpu.core_type = #tpu.core_type<tc>, window_params = [{transform_indices = @transform_0, window_bounds = array<i64: 8, 128>}, {transform_indices = @transform_1, window_bounds = array<i64: 128, 128>}, {transform_indices = @transform_2, window_bounds = array<i64: 1, 128>}, {transform_indices = @transform_3, window_bounds = array<i64: 1, 128>}, {transform_indices = @transform_4, window_bounds = array<i64: 8, 128>}]} {
    %c0 = arith.constant 0 : index
    %c0_0 = arith.constant 0 : index
    %0 = vector.load %arg3[%c0, %c0_0] : memref<8x128xf32, #tpu.memory_space<vmem>>, vector<8x128xf32>
    %c0_1 = arith.constant 0 : index
    %c0_2 = arith.constant 0 : index
    %1 = vector.load %arg4[%c0_1, %c0_2] : memref<128x128xf32, #tpu.memory_space<vmem>>, vector<128x128xf32>
    %cst = arith.constant dense<0.000000e+00> : vector<8x128xf32>
    %2 = tpu.matmul %0, %1, %cst {dimension_numbers = #tpu.dot_dimension_numbers<[1], [0], [0], [1], [0, 0, 1, 1], [], []>} : vector<8x128xf32>, vector<128x128xf32>, vector<8x128xf32> -> vector<8x128xf32>
    %c0_i32 = arith.constant 0 : i32
    %3 = arith.cmpi eq, %arg2, %c0_i32 : i32
    %4 = arith.extui %3 : i1 to i32
    %c0_i32_3 = arith.constant 0 : i32
    %5 = arith.cmpi ne, %4, %c0_i32_3 : i32
    scf.if %5 {
      %c0_7 = arith.constant 0 : index
      %c0_8 = arith.constant 0 : index
      %12 = vector.load %arg8[%c0_7, %c0_8] : memref<8x128xf32, #tpu.memory_space<vmem>>, vector<8x128xf32>
      tpu.vector_store %arg8[%c0_7, %c0_8], %2 {strides = array<i32>} : memref<8x128xf32, #tpu.memory_space<vmem>>, vector<8x128xf32>,
    } else {
    }
    %c0_i32_4 = arith.constant 0 : i32
    %6 = arith.cmpi sgt, %arg2, %c0_i32_4 : i32
    %7 = arith.extui %6 : i1 to i32
    %c0_i32_5 = arith.constant 0 : i32
    %8 = arith.cmpi ne, %7, %c0_i32_5 : i32
    scf.if %8 {
      %c0_7 = arith.constant 0 : index
      %c0_8 = arith.constant 0 : index
      %12 = vector.load %arg8[%c0_7, %c0_8] : memref<8x128xf32, #tpu.memory_space<vmem>>, vector<8x128xf32>
      %13 = arith.addf %12, %2 : vector<8x128xf32>
      %c0_9 = arith.constant 0 : index
      %c0_10 = arith.constant 0 : index
      %14 = vector.load %arg8[%c0_9, %c0_10] : memref<8x128xf32, #tpu.memory_space<vmem>>, vector<8x128xf32>
      tpu.vector_store %arg8[%c0_9, %c0_10], %13 {strides = array<i32>} : memref<8x128xf32, #tpu.memory_space<vmem>>, vector<8x128xf32>,
    } else {
    }
    %c2_i32 = arith.constant 2 : i32
    %9 = arith.cmpi eq, %arg2, %c2_i32 : i32
    %10 = arith.extui %9 : i1 to i32
    %c0_i32_6 = arith.constant 0 : i32
    %11 = arith.cmpi ne, %10, %c0_i32_6 : i32
    scf.if %11 {
      %c0_7 = arith.constant 0 : index
      %c0_8 = arith.constant 0 : index
      %12 = vector.load %arg8[%c0_7, %c0_8] : memref<8x128xf32, #tpu.memory_space<vmem>>, vector<8x128xf32>
      %c0_9 = arith.constant 0 : index
      %c0_10 = arith.constant 0 : index
      %13 = vector.load %arg5[%c0_9, %c0_10] : memref<1x128xf32, #tpu.memory_space<vmem>>, vector<1x128xf32>
      %14 = vector.broadcast %13 : vector<1x128xf32> to vector<8x128xf32>
      %15 = arith.mulf %12, %14 : vector<8x128xf32>
      %c0_11 = arith.constant 0 : index
      %c0_12 = arith.constant 0 : index
      %16 = vector.load %arg6[%c0_11, %c0_12] : memref<1x128xf32, #tpu.memory_space<vmem>>, vector<1x128xf32>
      %17 = vector.broadcast %16 : vector<1x128xf32> to vector<8x128xf32>
      %18 = arith.addf %15, %17 : vector<8x128xf32>
      %cst_13 = arith.constant 5.000000e-01 : f32
      %19 = vector.broadcast %cst_13 : f32 to vector<8x128xf32>
      %20 = arith.mulf %19, %18 : vector<8x128xf32>
      %cst_14 = arith.constant 0.797884583 : f32
      %21 = vector.broadcast %cst_14 : f32 to vector<8x128xf32>
      %22 = arith.mulf %18, %21 : vector<8x128xf32>
      %cst_15 = arith.constant 4.471500e-02 : f32
      %23 = vector.broadcast %cst_15 : f32 to vector<8x128xf32>
      %24 = arith.mulf %23, %18 : vector<8x128xf32>
      %25 = arith.mulf %24, %18 : vector<8x128xf32>
      %cst_16 = arith.constant 1.000000e+00 : f32
      %26 = vector.broadcast %cst_16 : f32 to vector<8x128xf32>
      %27 = arith.addf %26, %25 : vector<8x128xf32>
      %28 = arith.mulf %22, %27 : vector<8x128xf32>
      %29 = math.tanh %28 : vector<8x128xf32>
      %cst_17 = arith.constant 1.000000e+00 : f32
      %30 = vector.broadcast %cst_17 : f32 to vector<8x128xf32>
      %31 = arith.addf %30, %29 : vector<8x128xf32>
      %32 = arith.mulf %20, %31 : vector<8x128xf32>
      %c0_18 = arith.constant 0 : index
      %c0_19 = arith.constant 0 : index
      %33 = vector.load %arg7[%c0_18, %c0_19] : memref<8x128xf32, #tpu.memory_space<vmem>>, vector<8x128xf32>
      tpu.vector_store %arg7[%c0_18, %c0_19], %32 {strides = array<i32>} : memref<8x128xf32, #tpu.memory_space<vmem>>, vector<8x128xf32>,
    } else {
    }
    return
  }
  func.func @transform_0(%arg0: i32, %arg1: i32, %arg2: i32) -> (i32, i32) {
    %c0_i32 = arith.constant 0 : i32
    return %arg0, %arg2 : i32, i32
  }
  func.func @transform_1(%arg0: i32, %arg1: i32, %arg2: i32) -> (i32, i32) {
    %c0_i32 = arith.constant 0 : i32
    return %arg2, %arg1 : i32, i32
  }
  func.func @transform_2(%arg0: i32, %arg1: i32, %arg2: i32) -> (i32, i32) {
    %c0_i32 = arith.constant 0 : i32
    %c0_i32_0 = arith.constant 0 : i32
    return %c0_i32, %arg1 : i32, i32
  }
  func.func @transform_3(%arg0: i32, %arg1: i32, %arg2: i32) -> (i32, i32) {
    %c0_i32 = arith.constant 0 : i32
    %c0_i32_0 = arith.constant 0 : i32
    return %c0_i32, %arg1 : i32, i32
  }
  func.func @transform_4(%arg0: i32, %arg1: i32, %arg2: i32) -> (i32, i32) {
    %c0_i32 = arith.constant 0 : i32
    return %arg0, %arg1 : i32, i32
  }
}

</mosaic_0001>

<bundles_post_ra>
// kernel: tpu_custom_call.1
= control target key start
LH: loop header
LB: loop body
LE: loop exit
PB: predicated region body
PF: predicated region fallthrough
CT: control target
= control target key end

     0   :  { %s1477_s0 = inlined_call_operand.hbm [shape: f32[16,384], index: 0, kind: input, shape index: {}]   ;;  %s1478_s1 = inlined_call_operand.hbm [shape: f32[384,256], index: 1, kind: input, shape index: {}]   ;;  %s1479_s2 = inlined_call_operand.hbm [shape: f32[1,256], index: 2, kind: input, shape index: {}]   ;;  %s1480_s3 = inlined_call_operand.vmem [shape: f32[1,256], index: 3, kind: input, shape index: {}]   ;;  %s1481_s4 = inlined_call_operand.hbm [shape: f32[16,256], index: 4, kind: output, shape index: {}]  }
   0x1   :  { %1497 = sst [smem:[#allocation29_spill]] %s1477_s0 }
   0x2   :  { %1498 = sst [smem:[#allocation30_spill]] %s1478_s1 }
   0x3   :  { %1499 = sst [smem:[#allocation31_spill]] %s1479_s2 }
   0x4   :  { %1500 = sst [smem:[#allocation32_spill]] %s1480_s3 }
   0x5   :  { %1501 = sst [smem:[#allocation33_spill]] %s1481_s4 }
   0x6   :  { %9 = vsyncpa [#allocation4], 0 }
   0x7   :  { %11 = vsyncpa [#allocation4 + $0x1], 0 }
   0x8   :  { %12 = vsyncpa [#allocation7], 0 }
   0x9   :  { %14 = vsyncpa [#allocation7 + $0x1], 0 }
   0xa   :  { %15 = vsyncpa [#allocation5], 0 }
   0xb   :  { %17 = vsyncpa [#allocation5 + $0x1], 0  ;;  %s1087_s15 = smov 0   ;;  %s1089_s16 = smov 0  }
   0xc   :  { %s1091_s17 = smov 0   ;;  %s1093_s18 = smov 0  }
   0xd   :  { %s1095_s19 = smov 0   ;;  %s1097_s20 = smov 0  }
   0xe   :  { %s1099_s21 = smov 0   ;;  %s1101_s22 = smov 0  }
   0xf   :  { %s1103_s23 = smov 0   ;;  %s1105_s24 = smov 0  }
  0x10   :  { %s1107_s25 = smov 0   ;;  %s1109_s26 = smov 0  }
  0x11   :  { %s1111_s27 = smov 0   ;;  %s1113_s28 = smov 0  }
  0x12   :  { %s1115_s29 = smov 0   ;;  %s1117_s30 = smov 0  }
  0x13   :  { %s1119_s5 = smov 0   ;;  %s1121_s6 = smov 0  }
  0x14   :  { %s1123_s7 = smov 0  }
  0x15 LB: > { %1502 = sst [smem:[#allocation14_spill]] %s1017_s23  ;;  %p1490_p0 = scmp.eq.s32.totalorder %s1057_s7, 0  ;;  %s1057_s7 = sphi %s1123_s7, %s23_s7   ;;  %s1053_s6 = sphi %s1121_s6, %s1556_s6   ;;  %s1049_s5 = sphi %s1119_s5, %s1567_s5   ;;  %s1045_s30 = sphi %s1117_s30, %s1566_s30   ;;  %s1041_s29 = sphi %s1115_s29, %s1551_s29   ;;  %s1037_s28 = sphi %s1113_s28, %s1565_s28   ;;  %s1033_s27 = sphi %s1111_s27, %s1564_s27   ;;  %s1029_s26 = sphi %s1109_s26, %s1550_s26   ;;  %s1025_s25 = sphi %s1107_s25, %s1549_s25   ;;  %s1021_s24 = sphi %s1105_s24, %s1563_s24   ;;  %s1017_s23 = sphi %s1103_s23, %s1547_s23   ;;  %s1013_s22 = sphi %s1101_s22, %s1562_s22   ;;  %s1009_s21 = sphi %s1099_s21, %s1561_s21   ;;  %s1005_s20 = sphi %s1097_s20, %s1560_s20   ;;  %s1001_s19 = sphi %s1095_s19, %s1559_s19   ;;  %s997_s18 = sphi %s1093_s18, %s1558_s18   ;;  %s993_s17 = sphi %s1091_s17, %s1557_s17   ;;  %s989_s16 = sphi %s1089_s16, %s1555_s16   ;;  %s985_s15 = sphi %s1087_s15, %s1553_s15  }
  0x16   : > { %1503 = sst [smem:[#allocation15_spill]] %s1025_s25  ;;  %p86_p1 = scmp.ne.s32.totalorder %s1017_s23, %s1013_s22 }
  0x17   : > { %1504 = sst [smem:[#allocation16_spill]] %s1029_s26  ;;  %p92_p2 = scmp.ne.s32.totalorder %s1013_s22, %s1009_s21 }
  0x18   : > { %1505 = sst [smem:[#allocation17_spill]] %s1033_s27  ;;  %p612_p3 = scmp.lt.s32.totalorder %s1057_s7, 12 }
  0x19   : > { %1506 = sst [smem:[#allocation18_spill]] %s1037_s28  ;;  %p88_p4 = por %p86_p1, %p1490_p0 }
  0x1a   : > { %1507 = sst [smem:[#allocation19_spill]] %s1041_s29  ;;  %s217_s9 = sand.u32 1, %s1057_s7  }
  0x1b   : > { %1508 = sst [smem:[#allocation20_spill]] %s1053_s6  ;;  %s219_s10 = sand.u32 1, %s1017_s23  }
  0x1c   : > { %s572_s11 = sshll.u32 %s219_s10, 7  ;;  %s588_s12 = sshll.u32 %s1045_s30, 5 }
  0x1d   : > { %s226_s13 = sadd.s32 %s1049_s5, %s588_s12  ;;  %s221_s4 = scalar_lea.vmem [#allocation6], %s572_s11 }
  0x1e   : > { %s575_s14 = sshll.u32 %s226_s13, 3  ;;  %s231_s29 = sshll.u32 %s221_s4, 4  ;;  %s232_s29 = int_to_ptr.vmem [resolvable:$true] %s231_s29 }
  0x1f   : > { %s1509_s1 = sld [smem:[#allocation30_spill]]  ;;  %p602_p5 = pnand %p612_p3, %p88_p4 }
  0x20   : > { %p576_p6 = scmp.ge.s32.totalorder %s1057_s7, 1  ;;  %s1201_s10 = scalar_lea.sflag [#allocation7], %s217_s9 }
  0x21   : > { %s1059_s4 = smov 256   ;;  %s1060_s27 = smov 128  }
  0x22   : > { %s1061_s8 = smov 8   ;;  %p262_p7 = scmp.lt.s32.totalorder %s1057_s7, 13 }
  0x23   : > { %s1210_s11 = sadd.s32 4294967295, %s1057_s7   ;;  %s35_s12 = sadd.s32 1, %s1045_s30 }
  0x24   : > { %p1205_p8 = pnand %p576_p6, %p262_p7  ;;  %s38_s13 = sadd.s32 1, %s1049_s5 }
  0x25   : > { %s228_s3 = scalar_lea.hbm %s1509_s1, %s575_s14  ;;  %p36_p9 = scmp.ge.s32.totalorder %s35_s12, 3 }
  0x26   : > { %s229_s28 = sshll.u32 %s228_s3, 4  ;;  %s42_s14 = sadd.s32 1, %s1053_s6  ;;  %s230_s28 = int_to_ptr.hbm [resolvable:$true] %s229_s28 }
  0x27   : > { %604 = dma.hbm_to_vmem [thread:$0]  (!%p602_p5), %s230_s28, 2048, %s232_s29, %s1201_s10, %s1059_s4, %s1060_s27, %s1061_s8  }
  0x28   : > { %s1510_s3 = scalar_select %p1205_p8, 1, 0 }
  0x29   : > { %s51_s28 = sadd.s32 1, %s1029_s26  ;;  %p58_p10 = scmp.ne.s32.totalorder %s1029_s26, %s1025_s25 }
  0x2a   : > { %1511 = sst [smem:[#allocation21_spill]] %s1510_s3  ;;  %s1569_s12 = smov (%p36_p9, %s35_s12), 0 }
  0x2b   : > { %1512 = sst [smem:[#allocation22_spill]] %s1569_s12  ;;  %s1571_s13 = smov (!%p36_p9, %s38_s13), %s1049_s5 }
  0x2c   : > { %s47_s29 = ssub.s32 %s1045_s30, %s1569_s12  ;;  %p1226_p11 = por %p1490_p0, %p58_p10 }
  0x2d   : > { %p40_p12 = scmp.ge.s32.totalorder %s1571_s13, 2  ;;  %p64_p13 = scmp.ne.s32.totalorder %s1025_s25, %s1021_s24 }
  0x2e   : > { %p65_p1 = scmp.eq.s32.totalorder %s1210_s11, 0  ;;  %s159_s27 = sadd.s32 1, %s993_s17 }
  0x2f   : > { %s1573_s13 = smov (%p40_p12, %s1571_s13), 0  ;;  %s1575_s14 = smov (!%p40_p12, %s42_s14), %s1053_s6 }
  0x30   : > { %1514 = sst [smem:[#allocation23_spill]] %s1573_s13  ;;  %p1239_p4 = por %p65_p1, %p64_p13 }
  0x31   : > { %s1245_s9 = ssub.s32 %s1049_s5, %s1573_s13  ;;  %p44_p5 = scmp.ge.s32.totalorder %s1575_s14, 2 }
  0x32   : > { %s1515_s8 = scalar_select %p1239_p4, 1, 0 }
  0x33   : > { %s76_s24 = sor.u32 %s1245_s9, %s47_s29  ;;  %p1253_p7 = por %p92_p2, %p65_p1 }
  0x34   : > { %1516 = sst [smem:[#allocation24_spill]] %s1515_s8  ;;  %p77_p6 = scmp.eq.s32.totalorder %s76_s24, 0 }
  0x35   : > { %s1517_s1 = scalar_select %p1253_p7, 1, 0 }
  0x36   : > { %s1577_s14 = smov (%p44_p5, %s1575_s14), 0  ;;  %s1520_s12 = sadd.s32 1, %s1017_s23 }
  0x37   : > { %1518 = sst [smem:[#allocation25_spill]] %s1517_s1  ;;  %s46_s8 = ssub.s32 %s1053_s6, %s1577_s14 }
  0x38   : > { %1519 = sst [smem:[#allocation26_spill]] %s1577_s14  ;;  %p169_p9 = scmp.ne.s32.totalorder %s993_s17, %s989_s16 }
  0x39   : > { %s1262_s13 = scalar_select %p77_p6, %s1017_s23, %s1520_s12  }
  0x3a   : > { %s48_s25 = sor.u32 %s47_s29, %s46_s8  ;;  %s156_s3 = sor.u32 %s1245_s9, %s46_s8 }
  0x3b   : > { %1521 = sst [smem:[#allocation27_spill]] %s1262_s13  ;;  %p49_p10 = scmp.eq.s32.totalorder %s48_s25, 0 }
  0x3c   : > { %p157_p12 = scmp.eq.s32.totalorder %s156_s3, 0  ;;  %p170_p13 = scmp.eq.s32.totalorder %s1210_s11, 11 }
  0x3d   : > { %p175_p0 = scmp.ne.s32.totalorder %s989_s16, %s985_s15  ;;  %s1524_s12 = sadd.s32 4294967294, %s1057_s7  }
  0x3e   : > { %s1273_s21 = scalar_select %p49_p10, %s1029_s26, %s51_s28  }
  0x3f   : > { %s1276_s24 = scalar_select %p157_p12, %s993_s17, %s159_s27  }
  0x40   : > { %1522 = sst [smem:[#allocation28_spill]] %s1273_s21  ;;  %p1278_p2 = por %p170_p13, %p169_p9 }
  0x41   : > { %p176_p5 = scmp.eq.s32.totalorder %s1524_s12, 11  ;;  %s196_s14 = sand.u32 1, %s1029_s26  }
  0x42   : > { %s589_s29 = smul.u32 3, %s1053_s6  ;;  %s570_s3 = sshll.u32 %s196_s14, 3 }
  0x43   : > { %p1286_p6 = por %p176_p5, %p175_p0  ;;  %s1526_s0 = sld [smem:[#allocation29_spill]] }
  0x44   : > { %s204_s28 = sadd.s32 %s1045_s30, %s589_s29  ;;  %s200_s6 = scalar_lea.vmem [#allocation3], %s570_s3 }
  0x45   : > { %s1525_s25 = scalar_select %p1286_p6, 1, 0 }
  0x46   : > { %s571_s27 = sshll.u32 %s204_s28, 3  ;;  %s210_s26 = sshll.u32 %s200_s6, 4  ;;  %s211_s26 = int_to_ptr.vmem [resolvable:$true] %s210_s26 }
  0x47   : > { %p599_p0 = pnand %p612_p3, %p1226_p11  ;;  %s197_s23 = scalar_lea.sflag [#allocation4], %s196_s14 }
  0x48   : > { %p103_p9 = scmp.eq.s32.totalorder %s1245_s9, 0  ;;  %s105_s29 = sadd.s32 1, %s1005_s20 }
  0x49   : > { %s206_s12 = scalar_lea.hbm %s1526_s0, %s571_s27  ;;  %p112_p10 = scmp.ne.s32.totalorder %s1005_s20, %s1001_s19 }
  0x4a   : > { %s208_s13 = sshll.u32 %s206_s12, 4  ;;  %p1527_p12 = scmp.eq.s32.totalorder %s1057_s7, 0  ;;  %s209_s13 = int_to_ptr.hbm [resolvable:$true] %s208_s13 }
  0x4b   : > { %601 = dma.hbm_to_vmem [thread:$0]  (!%p599_p0), %s209_s13, 128, %s211_s26, %s197_s23  }
  0x4c   : > { %s1303_s21 = scalar_select %p103_p9, %s1005_s20, %s105_s29  }
  0x4d   : > { %p114_p13 = por %p112_p10, %p1527_p12  ;;  %p118_p5 = scmp.ne.s32.totalorder %s1001_s19, %s997_s18 }
  0x4e   : > { %s243_s3 = sand.u32 1, %s1005_s20   ;;  %s1528_s2 = sld [smem:[#allocation31_spill]] }
  0x4f   : > { %p1316_p6 = por %p118_p5, %p65_p1  ;;  %s244_s26 = scalar_lea.vmem [#allocation8], %s243_s3 }
  0x50   : > { %s251_s9 = sshll.u32 %s244_s26, 4  ;;  %p605_p11 = pnand %p612_p3, %p114_p13  ;;  %s252_s9 = int_to_ptr.vmem [resolvable:$true] %s251_s9 }
  0x51   : > { %s1531_s18 = sld [smem:[#allocation15_spill]] (!%p1205_p8) }
  0x52   : > { %266 = sbr.rel (%p1205_p8) target bundleno = 336 (0x150), region = 36 }
  0x54   : > { %s247_s27 = scalar_lea.hbm %s1528_s2, %s1049_s5 }
  0x55   : > { %s249_s23 = sshll.u32 %s247_s27, 4  ;;  %s250_s23 = int_to_ptr.hbm [resolvable:$true] %s249_s23 }
  0x56   : > { %607 = dma.hbm_to_vmem [thread:$0]  (!%p605_p11), %s250_s23, 16, %s252_s9, %s1201_s10  }
  0x57   : > { %s268_s8 = sand.u32 1, %s1531_s18  }
  0x58   : > { %s1326_s12 = sshll.u32 %s268_s8, 3  ;;  %s269_s29 = scalar_lea.sflag [#allocation4], %s268_s8 }
  0x59   : > { %s272_s6 = scalar_lea.vmem [#allocation3], %s1326_s12 }
  0x5a   : > { %968 = dma.done.wait (%p1239_p4), %s269_s29, 128  }
  0x5b   : > { %970 = vsyncadd (%p1239_p4), %s269_s29, 4294967168  ;;  %s278_s10 = sand.u32 1, %s1210_s11   ;;  %s280_s28 = sand.u32 1, %s1013_s22  }
  0x5c   : > { %s578_s27 = sshll.u32 %s280_s28, 7  ;;  %s279_s23 = scalar_lea.sflag [#allocation7], %s278_s10 }
  0x5d   : > { %s1335_s26 = scalar_lea.vmem [#allocation6], %s578_s27 }
  0x5e   : > { %972 = dma.done.wait (%p1253_p7), %s279_s23, 2048  }
  0x5f   : > { %974 = vsyncadd (%p1253_p7), %s279_s23, 4294965248  ;;  %s290_s9 = sand.u32 1, %s1001_s19  }
  0x60   : > { %s1342_s13 = scalar_lea.vmem [#allocation8], %s290_s9 }
  0x61   : > { %976 = dma.done.wait (%p1316_p6), %s279_s23, 16  }
  0x62   : > { %978 = vsyncadd (%p1316_p6), %s279_s23, 4294967280  ;;  %s1534_s11 = sld [smem:[#allocation18_spill]]  ;;  %s326_s18 = sand.u32 1, %s989_s16   ;;  %v349_v0 = vld [vmem:[%s1335_s26 + $0x78] sm:$0xff]  ;;  %v348_v1 = vld [vmem:[%s1335_s26 + $0x70] sm:$0xff] }
  0x63   : > { %s1352_s14 = sshll.u32 %s326_s18, 3  ;;  %s1535_s29 = sld [smem:[#allocation32_spill]]  ;;  %350 = vmatpush.msra.mxu0 %v349_v0  ;;  %v347_v2 = vld [vmem:[%s1335_s26 + $0x68] sm:$0xff]  ;;  %v346_v3 = vld [vmem:[%s1335_s26 + $0x60] sm:$0xff]  ;;  %v345_v4 = vld [vmem:[%s1335_s26 + $0x58] sm:$0xff] }
  0x64   : > { %v344_v5 = vld [vmem:[%s1335_s26 + $0x50] sm:$0xff]  ;;  %v343_v6 = vld [vmem:[%s1335_s26 + $0x48] sm:$0xff]  ;;  %v342_v7 = vld [vmem:[%s1335_s26 + $0x40] sm:$0xff]  ;;  %s328_s10 = scalar_lea.vmem [#allocation9], %s1352_s14  ;;  %s1536_s28 = sld [smem:[#allocation17_spill]] }
  0x65   : > { %351 = vmatpush.msra.mxu0 %v348_v1  ;;  %v341_v8 = vld [vmem:[%s1335_s26 + $0x38] sm:$0xff]  ;;  %v340_v9 = vld [vmem:[%s1335_s26 + $0x30] sm:$0xff]  ;;  %v339_v10 = vld [vmem:[%s1335_s26 + $0x28] sm:$0xff] }
  0x66   : > { %v338_v11 = vld [vmem:[%s1335_s26 + $0x20] sm:$0xff]  ;;  %v337_v12 = vld [vmem:[%s1335_s26 + $0x18] sm:$0xff]  ;;  %v336_v13 = vld [vmem:[%s1335_s26 + $0x10] sm:$0xff] }
  0x67   : > { %352 = vmatpush.msra.mxu0 %v347_v2  ;;  %v335_v14 = vld [vmem:[%s1335_s26 + $0x8] sm:$0xff]  ;;  %v334_v15 = vld [vmem:[%s1335_s26] sm:$0xff]  ;;  %v333_v16 = vld [vmem:[%s272_s6] sm:$0xff] }
  0x68   : > { %p330_p3 = scmp.lt.s32.totalorder %s1534_s11, 1 }
  0x69   : > { %353 = vmatpush.msra.mxu0 %v346_v3 }
  0x6a   : > { %s1579_s11 = smov (!%p330_p3, %s1534_s11), 1  ;;  %p580_p8 = scmp.ne.s32.totalorder %s1536_s28, 0 }
  0x6b   : > { %s332_s3 = scalar_lea.vmem %s1535_s29, %s1579_s11  ;;  %354 = vmatpush.msra.mxu0 %v345_v4 }
  0x6d   : > { %355 = vmatpush.msra.mxu0 %v344_v5 }
  0x6f   : > { %356 = vmatpush.msra.mxu0 %v343_v6 }
  0x71   : > { %357 = vmatpush.msra.mxu0 %v342_v7 }
  0x73   : > { %358 = vmatpush.msra.mxu0 %v341_v8 }
  0x75   : > { %359 = vmatpush.msra.mxu0 %v340_v9 }
  0x77   : > { %360 = vmatpush.msra.mxu0 %v339_v10 }
  0x79   : > { %361 = vmatpush.msra.mxu0 %v338_v11 }
  0x7b   : > { %362 = vmatpush.msra.mxu0 %v337_v12 }
  0x7d   : > { %363 = vmatpush.msra.mxu0 %v336_v13 }
  0x7f   : > { %364 = vmatpush.msra.mxu0 %v335_v14 }
  0x81   : > { %365 = vmatpush.msra.mxu0 %v334_v15 }
  0x82   : > { %366 = vmatmul.f32.vlgmr.msra.gmra.mxu0 %v333_v16 }
  0xfb   : > { %373 = sbr.rel (%p580_p8) target bundleno = 257 (0x101), region = 52 }
  0xff   : > { %v367_v17 = vpop.f32.mrf.mxu0 }
 0x100   : > { %374 = vst [vmem:[#allocation2] sm:$0xff] %v367_v17 }
 0x101 PF: > { %s1537_s27 = sld [smem:[#allocation17_spill]] }
 0x107   : > { %p581_p1 = scmp.le.s32.totalorder %s1537_s27, 0 }
 0x109   : > { %378 = sbr.rel (%p581_p1) target bundleno = 274 (0x112), region = 56 }
 0x10e   : > { %v379_v18 = vld [vmem:[#allocation2] sm:$0xff] }
 0x10f   : > { %v380_v19 = vadd.f32 %v379_v18, %v367_v17 }
 0x111   : > { %381 = vst [vmem:[#allocation2] sm:$0xff] %v380_v19 }
 0x112 PF: > { %s1538_s23 = sld [smem:[#allocation17_spill]] }
 0x118   : > { %p582_p4 = scmp.ne.s32.totalorder %s1538_s23, 2 }
 0x11a   : > { %385 = sbr.rel (%p582_p4) target bundleno = 313 (0x139), region = 60 }
 0x11f   : > { %v386_v20 = vld [vmem:[#allocation2] sm:$0xff] }
 0x120   : > { %v769_v21 = vld [vmem:[%s1342_s13] ss:$0 sm:$0xff] }
 0x121   : > { %v770_v22 = vld [vmem:[%s332_s3] ss:$0 sm:$0xff]  ;;  %v391_v23 = vmul.f32 %v769_v21, %v386_v20 }
 0x123   : > { %v396_v24 = vadd.f32 %v770_v22, %v391_v23 }
 0x125   : > { %v399_v25 = vmul.f32 0.044715, %v396_v24  ;;  %v398_v26 = vmul.f32 0.7978846, %v396_v24  ;;  %v397_v30 = vmul.f32 0.5, %v396_v24 }
 0x127   : > { %v400_v27 = vmul.f32 %v399_v25, %v396_v24 }
 0x129   : > { %v401_v28 = vadd.f32 1.0, %v400_v27 }
 0x12b   : > { %v402_v29 = vmul.f32 %v401_v28, %v398_v26 }
 0x12d   : > { %771 = vtanh.f32 %v402_v29 }
 0x133   : > { %v772_v31 = vpop.eup %771 }
 0x134   : > { %v404_v32 = vadd.f32 1.0, %v772_v31 }
 0x136   : > { %v405_v33 = vmul.f32 %v404_v32, %v397_v30 }
 0x138   : > { %406 = vst [vmem:[%s328_s10] sm:$0xff] %v405_v33 }
 0x139 PF: > { %s1540_s9 = sld [smem:[#allocation19_spill]]  ;;  %s422_s8 = sshll.u32 %s328_s10, 4  ;;  %s423_s8 = int_to_ptr.vmem [resolvable:$true] %s422_s8 }
 0x13a   : > { %s1541_s13 = sld [smem:[#allocation18_spill]]  ;;  %s408_s26 = scalar_lea.sflag [#allocation5], %s326_s18 }
 0x13b   : > { %s1542_s27 = sld [smem:[#allocation33_spill]] }
 0x13f   : > { %s584_s11 = sshll.u32 %s1540_s9, 1 }
 0x140   : > { %s418_s4 = sadd.s32 %s1541_s13, %s584_s11 }
 0x141   : > { %s585_s29 = sshll.u32 %s418_s4, 3  ;;  %s1543_s12 = smov %s1542_s27 }
 0x142   : > { %s420_s23 = scalar_lea.hbm %s1542_s27, %s585_s29  ;;  %s883_s10 = scalar_lea.hbm %s1543_s12, 32 }
 0x143   : > { %s424_s6 = sshll.u32 %s420_s23, 4  ;;  %s425_s6 = int_to_ptr.hbm [resolvable:$true] %s424_s6 }
 0x144   : > { %s877_s0 = sshra.s32 %s425_s6, 4  ;;  %s878_s0 = int_to_ptr.hbm [resolvable:$true] %s877_s0 }
 0x145   : > { %s879_s2 = scalar_lea.hbm %s878_s0, 8  ;;  %p884_p9 = scmp.lt.s32.totalorder %s878_s0, %s1543_s12 }
 0x146   : > { %p880_p7 = scmp.ne.s32.totalorder %s878_s0, %s879_s2  ;;  %p885_p10 = scmp.lt.s32.totalorder %s883_s10, %s879_s2 }
 0x148   : > { %p881_p6 = pnand %p880_p7, %p1278_p2  ;;  %p886_p12 = por %p885_p10, %p884_p9 }
 0x14a   : > { %p882_p0 = pneg %p881_p6 }
 0x14c   : > { %p887_p13 = pnand %p886_p12, %p882_p0 }
 0x14e   : > { %890 = shalt.err (!%p887_p13)
}
 0x14f   : > { %596 = dma.vmem_to_hbm [thread:$0]  (%p1278_p2), %s423_s8, 128, %s425_s6, %s408_s26  }
 0x150 PF: > { %p613_p5 = scmp.ge.s32.totalorder %s1057_s7, 2  ;;  %s436_s18 = sand.u32 1, %s985_s15  }
 0x151   : > { %p1544_p11 = scmp.ne.s32.totalorder %s1525_s25, 0  ;;  %s437_s4 = scalar_lea.sflag [#allocation5], %s436_s18 }
 0x153   : > { %p609_p3 = pnand %p613_p5, %p1544_p11 }
 0x155   : > { %p610_p8 = pneg %p609_p3 }
 0x157   : > { %980 = dma.done.wait (%p610_p8), %s437_s4, 128  }
 0x158   : > { %982 = vsyncadd (%p610_p8), %s437_s4, 4294967168  ;;  %s23_s7 = sadd.s32 1, %s1057_s7   ;;  %s1546_s1 = sld [smem:[#allocation14_spill]] }
 0x159   : > { %p1415_p1 = scmp.ge.s32.totalorder %s23_s7, 14   ;;  %s1547_s23 = sld [smem:[#allocation27_spill]] }
 0x15a   : > { %s1548_s2 = sld [smem:[#allocation15_spill]]  ;;  %s1553_s15 = smov %s989_s16 }
 0x15b   : > { %s1549_s25 = sld [smem:[#allocation16_spill]]  ;;  %s1555_s16 = smov %s993_s17 }
 0x15c   : > { %s1550_s26 = sld [smem:[#allocation28_spill]]  ;;  %s1557_s17 = smov %s1276_s24 }
 0x15d   : > { %s1551_s29 = sld [smem:[#allocation20_spill]]  ;;  %s1558_s18 = smov %s1001_s19 }
 0x15e   : > { %s1552_s8 = sld [smem:[#allocation22_spill]]  ;;  %s1559_s19 = smov %s1005_s20 }
 0x15f   : > { %s1554_s3 = sld [smem:[#allocation23_spill]]  ;;  %s1560_s20 = smov %s1303_s21 }
 0x160   : > { %s1556_s6 = sld [smem:[#allocation26_spill]]  ;;  %s1561_s21 = smov %s1013_s22 }
 0x161   : > { %s1562_s22 = smov %s1546_s1  ;;  %s1563_s24 = smov %s1548_s2 }
 0x162   : > { %s1564_s27 = smov %s1045_s30  ;;  %s1565_s28 = smov %s1049_s5 }
 0x163   :  { %22 = sbr.rel (!%p1415_p1) target bundleno = 21 (0x15), region = 120 }
 0x164   : > { %s1566_s30 = smov %s1552_s8 }
 0x165   : > { %s1567_s5 = smov %s1554_s3 }
 0x168   :  { %443 = vsyncpa [#allocation4], 1 }
 0x169   :  { %445 = vsyncpa [#allocation4 + $0x1], 1 }
 0x16a   :  { %446 = vsyncpa [#allocation7], 1 }
 0x16b   :  { %448 = vsyncpa [#allocation7 + $0x1], 1 }
 0x16c   :  { %449 = vsyncpa [#allocation5], 1 }
 0x16d   :  { %451 = vsyncpa [#allocation5 + $0x1], 1 }

</bundles_post_ra>
